<compile_context>
chip_gen: v6e
topology: v6e:2x2x1
jax: 0.10.0
libtpu: 0.0.40
codegen_flags: <defaults>
</compile_context>

<pallas_src>
import jax
import jax.numpy as jnp
from jax.experimental import pallas as pl
from jax.experimental.pallas import tpu as pltpu


# ------------------------------ kernels ------------------------------------ #

def sage_layer_kernel(adj_ref, xfull_ref, xrow_ref, w_ref, b_ref, h_ref):
    """One SAGEConv layer for a row tile of nodes.

    adj_ref:   (TM, Np)      bf16   row-normalized adjacency rows of this tile
    xfull_ref: (Np, F)       bf16   full node features (resident)
    xrow_ref:  (TM, F)       bf16   root-node features of this tile
    w_ref:     (2F, H)       bf16   [Wl ; Wr] stacked along contraction axis
    b_ref:     (1, H)        f32
    h_ref:     (TM, H)       bf16   relu output
    """
    # mean-neighbor aggregation for this tile (f32 accumulate on MXU)
    agg = jnp.dot(adj_ref[...], xfull_ref[...], preferred_element_type=jnp.float32)
    # fused [agg | x_root] @ [Wl ; Wr]  -- single MXU pass, K = 2F
    z = jnp.concatenate([agg.astype(xrow_ref.dtype), xrow_ref[...]], axis=-1)
    h = jnp.dot(z, w_ref[...], preferred_element_type=jnp.float32) + b_ref[...]
    # dropout(p=0.5, training=False) -> identity
    h_ref[...] = jnp.maximum(h, 0.0).astype(h_ref.dtype)


def sage_cls_kernel(adj_ref, h1full_ref, h1row_ref, xt_ref,
                    w2_ref, b2_ref, wc_ref, bc_ref,
                    logits_ref, gemb_ref):
    """Second SAGEConv layer fused with the linear classifier for a row tile."""
    agg = jnp.dot(adj_ref[...], h1full_ref[...], preferred_element_type=jnp.float32)
    z = jnp.concatenate([agg.astype(h1row_ref.dtype), h1row_ref[...]], axis=-1)
    h2 = jnp.maximum(
        jnp.dot(z, w2_ref[...], preferred_element_type=jnp.float32) + b2_ref[...], 0.0)
    gemb_ref[...] = h2.astype(gemb_ref.dtype)
    # classifier on concat([x_text, graph_emb]) -- single fused matmul
    zc = jnp.concatenate([xt_ref[...], h2.astype(xt_ref.dtype)], axis=-1)
    logits_ref[...] = (jnp.dot(zc, wc_ref[...], preferred_element_type=jnp.float32)
                       + bc_ref[...]).astype(logits_ref.dtype)


# ------------------------------ wrapper ------------------------------------ #

_LANE = 128


def _round_up(x, m):
    return (x + m - 1) // m * m


def _pad2(a, rows, cols, dtype=None):
    dt = a.dtype if dtype is None else dtype
    out = jnp.zeros((rows, cols), dt)
    return out.at[: a.shape[0], : a.shape[1]].set(a.astype(dt))


def cfics_forward(x_text, x_graph, edge_index, params):
    """CFiCS forward (eval mode). Returns (logits, graph_emb)."""
    n = x_graph.shape[0]
    text_dim = x_text.shape[1]
    graph_dim = x_graph.shape[1]
    wl1, wr1, b1, wl2, wr2, b2, wct, wcg, bc = params
    hidden = wl1.shape[1]
    total_classes = wct.shape[1]

    # dense row-normalized adjacency (mean aggregation; parallel edges weighted
    # by multiplicity consistently in numerator and degree)
    src, dst = edge_index[0], edge_index[1]
    adj = jnp.zeros((n, n), jnp.float32).at[dst, src].add(1.0)
    deg = adj.sum(axis=1, keepdims=True)
    adj = adj / jnp.maximum(deg, 1.0)

    # ---- padded / fused bf16 layouts ----
    bf = jnp.bfloat16
    tm = 256 if n >= 256 else _round_up(n, 8)       # node-row tile
    n_pad = _round_up(n, tm)
    dg_pad = _round_up(graph_dim, _LANE)
    dt_pad = _round_up(text_dim, _LANE)
    h_pad = _round_up(hidden, _LANE)
    c_pad = _round_up(total_classes, _LANE)

    adj_p = _pad2(adj, n_pad, n_pad, bf)
    xg_p = _pad2(x_graph, n_pad, dg_pad, bf)
    xt_p = _pad2(x_text, n_pad, dt_pad, bf)

    # stacked-along-K fused weights (zero-padded rows/cols keep math exact)
    w1 = jnp.concatenate([_pad2(wl1, dg_pad, h_pad, bf),
                          _pad2(wr1, dg_pad, h_pad, bf)], axis=0)      # (2*dg_pad, h_pad)
    w2 = jnp.concatenate([_pad2(wl2, h_pad, h_pad, bf),
                          _pad2(wr2, h_pad, h_pad, bf)], axis=0)       # (2*h_pad, h_pad)
    wc = jnp.concatenate([_pad2(wct, dt_pad, c_pad, bf),
                          _pad2(wcg, h_pad, c_pad, bf)], axis=0)       # (dt_pad+h_pad, c_pad)
    b1_p = _pad2(b1, 1, h_pad)   # f32 (added after f32 accumulation)
    b2_p = _pad2(b2, 1, h_pad)
    bc_p = _pad2(bc, 1, c_pad)

    grid_m = n_pad // tm
    cparams = pltpu.CompilerParams(dimension_semantics=("parallel",))

    # deeper buffering only on the HBM-heavy adjacency stream, only when the
    # grid is long enough for it to matter (no-op at toy size)
    adj_kwargs = {"pipeline_mode": pl.Buffered(3)} if grid_m > 2 else {}
    adj_spec = pl.BlockSpec((tm, n_pad), lambda i: (i, 0), **adj_kwargs)

    def const2(shape):
        return pl.BlockSpec(shape, lambda i: (0, 0))

    def row_spec(cols):
        return pl.BlockSpec((tm, cols), lambda i: (i, 0))

    # ---- call A: SAGE layer 1 -> h1 (bf16, padded) ----
    ce1 = pl.CostEstimate(
        flops=2 * n_pad * n_pad * dg_pad + 2 * n_pad * (2 * dg_pad) * h_pad,
        transcendentals=0,
        bytes_accessed=(adj_p.size * 2 + 2 * xg_p.size * 2 + w1.size * 2
                        + b1_p.size * 4 + n_pad * h_pad * 2),
    )
    h1 = pl.pallas_call(
        sage_layer_kernel,
        grid=(grid_m,),
        in_specs=[adj_spec,
                  const2((n_pad, dg_pad)),        # full features (resident)
                  row_spec(dg_pad),               # root rows of this tile
                  const2((2 * dg_pad, h_pad)),
                  const2((1, h_pad))],
        out_specs=row_spec(h_pad),
        out_shape=jax.ShapeDtypeStruct((n_pad, h_pad), bf),
        compiler_params=cparams,
        cost_estimate=ce1,
    )(adj_p, xg_p, xg_p, w1, b1_p)

    # ---- call B: SAGE layer 2 + classifier ----
    ce2 = pl.CostEstimate(
        flops=(2 * n_pad * n_pad * h_pad
               + 2 * n_pad * (2 * h_pad) * h_pad
               + 2 * n_pad * (dt_pad + h_pad) * c_pad),
        transcendentals=0,
        bytes_accessed=(adj_p.size * 2 + 2 * h1.size * 2 + xt_p.size * 2
                        + w2.size * 2 + wc.size * 2
                        + (b2_p.size + bc_p.size) * 4
                        + n_pad * (c_pad + h_pad) * 4),
    )
    logits_p, gemb_p = pl.pallas_call(
        sage_cls_kernel,
        grid=(grid_m,),
        in_specs=[adj_spec,
                  const2((n_pad, h_pad)),         # full h1 (resident)
                  row_spec(h_pad),                # h1 root rows of this tile
                  row_spec(dt_pad),
                  const2((2 * h_pad, h_pad)),
                  const2((1, h_pad)),
                  const2((dt_pad + h_pad, c_pad)),
                  const2((1, c_pad))],
        out_specs=(row_spec(c_pad), row_spec(h_pad)),
        out_shape=(jax.ShapeDtypeStruct((n_pad, c_pad), jnp.float32),
                   jax.ShapeDtypeStruct((n_pad, h_pad), jnp.float32)),
        compiler_params=cparams,
        cost_estimate=ce2,
    )(adj_p, h1, h1, xt_p, w2, b2_p, wc, bc_p)

    return logits_p[:n, :total_classes], gemb_p[:n, :hidden]


# --------------------------- params & references ---------------------------- #

def init_params(key, text_dim, graph_dim, hidden, total_classes):
    """Deterministic synthetic parameters (shapes match the PyTorch module)."""
    ks = jax.random.split(key, 8)

    def lin_w(k, fan_in, fan_out):
        s = 1.0 / jnp.sqrt(jnp.float32(fan_in))
        return jax.random.uniform(k, (fan_in, fan_out), jnp.float32, -s, s)

    def lin_b(k, fan_in, fan_out):
        s = 1.0 / jnp.sqrt(jnp.float32(fan_in))
        return jax.random.uniform(k, (1, fan_out), jnp.float32, -s, s)

    wl1 = lin_w(ks[0], graph_dim, hidden)       # SAGEConv lin_l (with bias)
    wr1 = lin_w(ks[1], graph_dim, hidden)       # SAGEConv lin_r (no bias)
    b1 = lin_b(ks[2], graph_dim, hidden)
    wl2 = lin_w(ks[3], hidden, hidden)
    wr2 = lin_w(ks[4], hidden, hidden)
    b2 = lin_b(ks[5], hidden, hidden)
    wc = lin_w(ks[6], text_dim + hidden, total_classes)
    wct = wc[:text_dim]
    wcg = wc[text_dim:]
    bc = lin_b(ks[7], text_dim + hidden, total_classes)
    return (wl1, wr1, b1, wl2, wr2, b2, wct, wcg, bc)


def _norm_adj(x_graph, edge_index):
    n = x_graph.shape[0]
    src, dst = edge_index[0], edge_index[1]
    adj = jnp.zeros((n, n), jnp.float32).at[dst, src].add(1.0)
    deg = adj.sum(axis=1, keepdims=True)
    return adj / jnp.maximum(deg, 1.0)


def reference_f32(x_text, x_graph, edge_index, params):
    """Pure-JAX f32 reference mirroring the PyTorch semantics (eval mode)."""
    adj = _norm_adj(x_graph, edge_index)
    wl1, wr1, b1, wl2, wr2, b2, wct, wcg, bc = params
    h = jnp.maximum(adj @ x_graph @ wl1 + x_graph @ wr1 + b1, 0.0)
    h = jnp.maximum(adj @ h @ wl2 + h @ wr2 + b2, 0.0)
    logits = x_text @ wct + h @ wcg + bc
    return logits, h


def reference_mirror(x_text, x_graph, edge_index, params):
    """Pure-JAX reference mirroring the kernel's bf16-input / f32-accumulate math."""
    bf, f32 = jnp.bfloat16, jnp.float32
    adj = _norm_adj(x_graph, edge_index).astype(bf)
    wl1, wr1, b1, wl2, wr2, b2, wct, wcg, bc = params
    xg, xt = x_graph.astype(bf), x_text.astype(bf)

    def mm(a, b):
        return jnp.dot(a, b.astype(bf), preferred_element_type=f32)

    agg1 = jnp.dot(adj, xg, preferred_element_type=f32).astype(bf)
    h1 = jnp.maximum(mm(agg1, wl1) + mm(xg, wr1) + b1, 0.0)
    h1b = h1.astype(bf)
    agg2 = jnp.dot(adj, h1b, preferred_element_type=f32).astype(bf)
    h2 = jnp.maximum(mm(agg2, wl2) + mm(h1b, wr2) + b2, 0.0)
    logits = mm(xt, wct) + mm(h2.astype(bf), wcg) + bc
    return logits, h2


# --------------------------------- main ------------------------------------- #

if __name__ == "__main__":
    # Small shapes consistent with the module's forward:
    #   x_text: [num_nodes, text_dim], x_graph: [num_nodes, graph_dim]
    num_nodes, text_dim, graph_dim, hidden = 8, 32, 16, 32
    num_common_factors, num_intervention_concepts, num_skills = 3, 3, 8
    total_classes = num_common_factors + num_intervention_concepts + num_skills

    key = jax.random.PRNGKey(0)
    k_xt, k_xg, k_p = jax.random.split(key, 3)
    x_text = jax.random.normal(k_xt, (num_nodes, text_dim), jnp.float32)
    x_graph = jax.random.normal(k_xg, (num_nodes, graph_dim), jnp.float32)

    # Bidirectional ring graph, edge_index: [2, num_edges]
    idx = jnp.arange(num_nodes)
    src = jnp.concatenate([idx, (idx + 1) % num_nodes])
    dst = jnp.concatenate([(idx + 1) % num_nodes, idx])
    edge_index = jnp.stack([src, dst], axis=0).astype(jnp.int32)

    params = init_params(k_p, text_dim, graph_dim, hidden, total_classes)

    logits, graph_emb = jax.jit(cfics_forward)(x_text, x_graph, edge_index, params)
    jax.block_until_ready((logits, graph_emb))

    assert logits.shape == (num_nodes, total_classes)
    assert graph_emb.shape == (num_nodes, hidden)

    # Tight check against a reference that mirrors the kernel's precision policy.
    mir_logits, mir_gemb = reference_mirror(x_text, x_graph, edge_index, params)
    assert jnp.allclose(logits, mir_logits, atol=2e-2, rtol=2e-2)
    assert jnp.allclose(graph_emb, mir_gemb, atol=2e-2, rtol=2e-2)

    # Loose sanity bound vs. the full-f32 PyTorch-semantics reference
    # (difference is only bf16 rounding of MXU inputs).
    f32_logits, f32_gemb = reference_f32(x_text, x_graph, edge_index, params)
    assert jnp.max(jnp.abs(logits - f32_logits)) < 0.5
    assert jnp.max(jnp.abs(graph_emb - f32_gemb)) < 0.5

    print("KERNEL_OK")
</pallas_src>

<mosaic_0001>
module attributes {stable_mosaic.version = 11 : i64} {
  func.func private @main(%arg0: i32) attributes {dimension_semantics = [#tpu.dimension_semantics<core_parallel>], iteration_bounds = array<i64: 2>, tpu.core_type = #tpu.core_type<sc_scalar_subcore>, window_params = []} {
    return
  }
}

module attributes {stable_mosaic.version = 11 : i64} {
  func.func private @main(%arg0: i32) attributes {dimension_semantics = [#tpu.dimension_semantics<core_parallel>], iteration_bounds = array<i64: 2>, tpu.core_type = #tpu.core_type<sc_scalar_subcore>, window_params = []} {
    return
  }
}

module attributes {stable_mosaic.version = 11 : i64} {
  func.func @sage_cls_kernel(%arg0: i32, %arg1: memref<8x8xbf16, #tpu.memory_space<vmem>>, %arg2: memref<8x128xbf16, #tpu.memory_space<vmem>>, %arg3: memref<8x128xbf16, #tpu.memory_space<vmem>>, %arg4: memref<8x128xbf16, #tpu.memory_space<vmem>>, %arg5: memref<256x128xbf16, #tpu.memory_space<vmem>>, %arg6: memref<1x128xf32, #tpu.memory_space<vmem>>, %arg7: memref<256x128xbf16, #tpu.memory_space<vmem>>, %arg8: memref<1x128xf32, #tpu.memory_space<vmem>>, %arg9: memref<8x128xf32, #tpu.memory_space<vmem>>, %arg10: memref<8x128xf32, #tpu.memory_space<vmem>>) attributes {dimension_semantics = [#tpu.dimension_semantics<parallel>], iteration_bounds = array<i64: 1>, scalar_prefetch = 0 : i64, scratch_operands = 0 : i64, tpu.core_type = #tpu.core_type<tc>, window_params = [{transform_indices = @transform_0, window_bounds = array<i64: 8, 8>}, {pipeline_mode = #tpu.pipeline_mode<synchronous>, transform_indices = @transform_1, window_bounds = array<i64: 8, 128>}, {transform_indices = @transform_2, window_bounds = array<i64: 8, 128>}, {transform_indices = @transform_3, window_bounds = array<i64: 8, 128>}, {pipeline_mode = #tpu.pipeline_mode<synchronous>, transform_indices = @transform_4, window_bounds = array<i64: 256, 128>}, {pipeline_mode = #tpu.pipeline_mode<synchronous>, transform_indices = @transform_5, window_bounds = array<i64: 1, 128>}, {pipeline_mode = #tpu.pipeline_mode<synchronous>, transform_indices = @transform_6, window_bounds = array<i64: 256, 128>}, {pipeline_mode = #tpu.pipeline_mode<synchronous>, transform_indices = @transform_7, window_bounds = array<i64: 1, 128>}, {transform_indices = @transform_8, window_bounds = array<i64: 8, 128>}, {transform_indices = @transform_9, window_bounds = array<i64: 8, 128>}]} {
    %c0 = arith.constant 0 : index
    %c0_0 = arith.constant 0 : index
    %0 = vector.load %arg1[%c0, %c0_0] : memref<8x8xbf16, #tpu.memory_space<vmem>>, vector<8x8xbf16>
    %c0_1 = arith.constant 0 : index
    %c0_2 = arith.constant 0 : index
    %1 = vector.load %arg2[%c0_1, %c0_2] : memref<8x128xbf16, #tpu.memory_space<vmem>>, vector<8x128xbf16>
    %cst = arith.constant dense<0.000000e+00> : vector<8x128xf32>
    %2 = tpu.matmul %0, %1, %cst {dimension_numbers = #tpu.dot_dimension_numbers<[1], [0], [0], [1], [0, 0, 1, 1], [], []>} : vector<8x8xbf16>, vector<8x128xbf16>, vector<8x128xf32> -> vector<8x128xf32>
    %3 = arith.truncf %2 : vector<8x128xf32> to vector<8x128xbf16>
    %c0_3 = arith.constant 0 : index
    %c0_4 = arith.constant 0 : index
    %4 = vector.load %arg3[%c0_3, %c0_4] : memref<8x128xbf16, #tpu.memory_space<vmem>>, vector<8x128xbf16>
    %5 = tpu.concatenate %3, %4 in 1 : vector<8x128xbf16>, vector<8x128xbf16> -> vector<8x256xbf16>
    %c0_5 = arith.constant 0 : index
    %c0_6 = arith.constant 0 : index
    %6 = vector.load %arg5[%c0_5, %c0_6] : memref<256x128xbf16, #tpu.memory_space<vmem>>, vector<256x128xbf16>
    %cst_7 = arith.constant dense<0.000000e+00> : vector<8x128xf32>
    %7 = tpu.matmul %5, %6, %cst_7 {dimension_numbers = #tpu.dot_dimension_numbers<[1], [0], [0], [1], [0, 0, 1, 1], [], []>} : vector<8x256xbf16>, vector<256x128xbf16>, vector<8x128xf32> -> vector<8x128xf32>
    %c0_8 = arith.constant 0 : index
    %c0_9 = arith.constant 0 : index
    %8 = vector.load %arg6[%c0_8, %c0_9] : memref<1x128xf32, #tpu.memory_space<vmem>>, vector<1x128xf32>
    %9 = vector.broadcast %8 : vector<1x128xf32> to vector<8x128xf32>
    %10 = arith.addf %7, %9 : vector<8x128xf32>
    %cst_10 = arith.constant 0.000000e+00 : f32
    %11 = vector.broadcast %cst_10 : f32 to vector<8x128xf32>
    %12 = arith.maximumf %10, %11 : vector<8x128xf32>
    %c0_11 = arith.constant 0 : index
    %c0_12 = arith.constant 0 : index
    %13 = vector.load %arg10[%c0_11, %c0_12] : memref<8x128xf32, #tpu.memory_space<vmem>>, vector<8x128xf32>
    tpu.vector_store %arg10[%c0_11, %c0_12], %12 {strides = array<i32>} : memref<8x128xf32, #tpu.memory_space<vmem>>, vector<8x128xf32>,
    %c0_13 = arith.constant 0 : index
    %c0_14 = arith.constant 0 : index
    %14 = vector.load %arg4[%c0_13, %c0_14] : memref<8x128xbf16, #tpu.memory_space<vmem>>, vector<8x128xbf16>
    %15 = arith.truncf %12 : vector<8x128xf32> to vector<8x128xbf16>
    %16 = tpu.concatenate %14, %15 in 1 : vector<8x128xbf16>, vector<8x128xbf16> -> vector<8x256xbf16>
    %c0_15 = arith.constant 0 : index
    %c0_16 = arith.constant 0 : index
    %17 = vector.load %arg7[%c0_15, %c0_16] : memref<256x128xbf16, #tpu.memory_space<vmem>>, vector<256x128xbf16>
    %cst_17 = arith.constant dense<0.000000e+00> : vector<8x128xf32>
    %18 = tpu.matmul %16, %17, %cst_17 {dimension_numbers = #tpu.dot_dimension_numbers<[1], [0], [0], [1], [0, 0, 1, 1], [], []>} : vector<8x256xbf16>, vector<256x128xbf16>, vector<8x128xf32> -> vector<8x128xf32>
    %c0_18 = arith.constant 0 : index
    %c0_19 = arith.constant 0 : index
    %19 = vector.load %arg8[%c0_18, %c0_19] : memref<1x128xf32, #tpu.memory_space<vmem>>, vector<1x128xf32>
    %20 = vector.broadcast %19 : vector<1x128xf32> to vector<8x128xf32>
    %21 = arith.addf %18, %20 : vector<8x128xf32>
    %c0_20 = arith.constant 0 : index
    %c0_21 = arith.constant 0 : index
    %22 = vector.load %arg9[%c0_20, %c0_21] : memref<8x128xf32, #tpu.memory_space<vmem>>, vector<8x128xf32>
    tpu.vector_store %arg9[%c0_20, %c0_21], %21 {strides = array<i32>} : memref<8x128xf32, #tpu.memory_space<vmem>>, vector<8x128xf32>,
    return
  }
  func.func @transform_0(%arg0: i32) -> (i32, i32) {
    %c0_i32 = arith.constant 0 : i32
    %c0_i32_0 = arith.constant 0 : i32
    return %arg0, %c0_i32 : i32, i32
  }
  func.func @transform_1(%arg0: i32) -> (i32, i32) {
    %c0_i32 = arith.constant 0 : i32
    %c0_i32_0 = arith.constant 0 : i32
    %c0_i32_1 = arith.constant 0 : i32
    return %c0_i32, %c0_i32_0 : i32, i32
  }
  func.func @transform_2(%arg0: i32) -> (i32, i32) {
    %c0_i32 = arith.constant 0 : i32
    %c0_i32_0 = arith.constant 0 : i32
    return %arg0, %c0_i32 : i32, i32
  }
  func.func @transform_3(%arg0: i32) -> (i32, i32) {
    %c0_i32 = arith.constant 0 : i32
    %c0_i32_0 = arith.constant 0 : i32
    return %arg0, %c0_i32 : i32, i32
  }
  func.func @transform_4(%arg0: i32) -> (i32, i32) {
    %c0_i32 = arith.constant 0 : i32
    %c0_i32_0 = arith.constant 0 : i32
    %c0_i32_1 = arith.constant 0 : i32
    return %c0_i32, %c0_i32_0 : i32, i32
  }
  func.func @transform_5(%arg0: i32) -> (i32, i32) {
    %c0_i32 = arith.constant 0 : i32
    %c0_i32_0 = arith.constant 0 : i32
    %c0_i32_1 = arith.constant 0 : i32
    return %c0_i32, %c0_i32_0 : i32, i32
  }
  func.func @transform_6(%arg0: i32) -> (i32, i32) {
    %c0_i32 = arith.constant 0 : i32
    %c0_i32_0 = arith.constant 0 : i32
    %c0_i32_1 = arith.constant 0 : i32
    return %c0_i32, %c0_i32_0 : i32, i32
  }
  func.func @transform_7(%arg0: i32) -> (i32, i32) {
    %c0_i32 = arith.constant 0 : i32
    %c0_i32_0 = arith.constant 0 : i32
    %c0_i32_1 = arith.constant 0 : i32
    return %c0_i32, %c0_i32_0 : i32, i32
  }
  func.func @transform_8(%arg0: i32) -> (i32, i32) {
    %c0_i32 = arith.constant 0 : i32
    %c0_i32_0 = arith.constant 0 : i32
    return %arg0, %c0_i32 : i32, i32
  }
  func.func @transform_9(%arg0: i32) -> (i32, i32) {
    %c0_i32 = arith.constant 0 : i32
    %c0_i32_0 = arith.constant 0 : i32
    return %arg0, %c0_i32 : i32, i32
  }
}

module attributes {stable_mosaic.version = 11 : i64} {
  func.func @sage_layer_kernel(%arg0: i32, %arg1: memref<8x8xbf16, #tpu.memory_space<vmem>>, %arg2: memref<8x128xbf16, #tpu.memory_space<vmem>>, %arg3: memref<8x128xbf16, #tpu.memory_space<vmem>>, %arg4: memref<256x128xbf16, #tpu.memory_space<vmem>>, %arg5: memref<1x128xf32, #tpu.memory_space<vmem>>, %arg6: memref<8x128xbf16, #tpu.memory_space<vmem>>) attributes {dimension_semantics = [#tpu.dimension_semantics<parallel>], iteration_bounds = array<i64: 1>, scalar_prefetch = 0 : i64, scratch_operands = 0 : i64, tpu.core_type = #tpu.core_type<tc>, window_params = [{transform_indices = @transform_0, window_bounds = array<i64: 8, 8>}, {pipeline_mode = #tpu.pipeline_mode<synchronous>, transform_indices = @transform_1, window_bounds = array<i64: 8, 128>}, {transform_indices = @transform_2, window_bounds = array<i64: 8, 128>}, {pipeline_mode = #tpu.pipeline_mode<synchronous>, transform_indices = @transform_3, window_bounds = array<i64: 256, 128>}, {pipeline_mode = #tpu.pipeline_mode<synchronous>, transform_indices = @transform_4, window_bounds = array<i64: 1, 128>}, {transform_indices = @transform_5, window_bounds = array<i64: 8, 128>}]} {
    %c0 = arith.constant 0 : index
    %c0_0 = arith.constant 0 : index
    %0 = vector.load %arg1[%c0, %c0_0] : memref<8x8xbf16, #tpu.memory_space<vmem>>, vector<8x8xbf16>
    %c0_1 = arith.constant 0 : index
    %c0_2 = arith.constant 0 : index
    %1 = vector.load %arg2[%c0_1, %c0_2] : memref<8x128xbf16, #tpu.memory_space<vmem>>, vector<8x128xbf16>
    %cst = arith.constant dense<0.000000e+00> : vector<8x128xf32>
    %2 = tpu.matmul %0, %1, %cst {dimension_numbers = #tpu.dot_dimension_numbers<[1], [0], [0], [1], [0, 0, 1, 1], [], []>} : vector<8x8xbf16>, vector<8x128xbf16>, vector<8x128xf32> -> vector<8x128xf32>
    %3 = arith.truncf %2 : vector<8x128xf32> to vector<8x128xbf16>
    %c0_3 = arith.constant 0 : index
    %c0_4 = arith.constant 0 : index
    %4 = vector.load %arg3[%c0_3, %c0_4] : memref<8x128xbf16, #tpu.memory_space<vmem>>, vector<8x128xbf16>
    %5 = tpu.concatenate %3, %4 in 1 : vector<8x128xbf16>, vector<8x128xbf16> -> vector<8x256xbf16>
    %c0_5 = arith.constant 0 : index
    %c0_6 = arith.constant 0 : index
    %6 = vector.load %arg4[%c0_5, %c0_6] : memref<256x128xbf16, #tpu.memory_space<vmem>>, vector<256x128xbf16>
    %cst_7 = arith.constant dense<0.000000e+00> : vector<8x128xf32>
    %7 = tpu.matmul %5, %6, %cst_7 {dimension_numbers = #tpu.dot_dimension_numbers<[1], [0], [0], [1], [0, 0, 1, 1], [], []>} : vector<8x256xbf16>, vector<256x128xbf16>, vector<8x128xf32> -> vector<8x128xf32>
    %c0_8 = arith.constant 0 : index
    %c0_9 = arith.constant 0 : index
    %8 = vector.load %arg5[%c0_8, %c0_9] : memref<1x128xf32, #tpu.memory_space<vmem>>, vector<1x128xf32>
    %9 = vector.broadcast %8 : vector<1x128xf32> to vector<8x128xf32>
    %10 = arith.addf %7, %9 : vector<8x128xf32>
    %cst_10 = arith.constant 0.000000e+00 : f32
    %11 = vector.broadcast %cst_10 : f32 to vector<8x128xf32>
    %12 = arith.maximumf %10, %11 : vector<8x128xf32>
    %13 = arith.truncf %12 : vector<8x128xf32> to vector<8x128xbf16>
    %c0_11 = arith.constant 0 : index
    %c0_12 = arith.constant 0 : index
    %14 = vector.load %arg6[%c0_11, %c0_12] : memref<8x128xbf16, #tpu.memory_space<vmem>>, vector<8x128xbf16>
    tpu.vector_store %arg6[%c0_11, %c0_12], %13 {strides = array<i32>} : memref<8x128xbf16, #tpu.memory_space<vmem>>, vector<8x128xbf16>,
    return
  }
  func.func @transform_0(%arg0: i32) -> (i32, i32) {
    %c0_i32 = arith.constant 0 : i32
    %c0_i32_0 = arith.constant 0 : i32
    return %arg0, %c0_i32 : i32, i32
  }
  func.func @transform_1(%arg0: i32) -> (i32, i32) {
    %c0_i32 = arith.constant 0 : i32
    %c0_i32_0 = arith.constant 0 : i32
    %c0_i32_1 = arith.constant 0 : i32
    return %c0_i32, %c0_i32_0 : i32, i32
  }
  func.func @transform_2(%arg0: i32) -> (i32, i32) {
    %c0_i32 = arith.constant 0 : i32
    %c0_i32_0 = arith.constant 0 : i32
    return %arg0, %c0_i32 : i32, i32
  }
  func.func @transform_3(%arg0: i32) -> (i32, i32) {
    %c0_i32 = arith.constant 0 : i32
    %c0_i32_0 = arith.constant 0 : i32
    %c0_i32_1 = arith.constant 0 : i32
    return %c0_i32, %c0_i32_0 : i32, i32
  }
  func.func @transform_4(%arg0: i32) -> (i32, i32) {
    %c0_i32 = arith.constant 0 : i32
    %c0_i32_0 = arith.constant 0 : i32
    %c0_i32_1 = arith.constant 0 : i32
    return %c0_i32, %c0_i32_0 : i32, i32
  }
  func.func @transform_5(%arg0: i32) -> (i32, i32) {
    %c0_i32 = arith.constant 0 : i32
    %c0_i32_0 = arith.constant 0 : i32
    return %arg0, %c0_i32 : i32, i32
  }
}

</mosaic_0001>

<bundles_post_ra>
// kernel: cfics_forward.2
= control target key start
LH: loop header
LB: loop body
LE: loop exit
PB: predicated region body
PF: predicated region fallthrough
CT: control target
= control target key end

     0   :  { %vm27_vm0 = vcmask 1043456   ;;  %v321_v0 = vmov 0.0   ;;  %vm322_vm1 = vmmov 0   ;;  %vm23_vm2 = vcmask 64512   ;;  %s416_s1 = inlined_call_operand.vmem [shape: bf16[8,128], index: 1, kind: input, shape index: {}, may-alias: {1,2}]   ;;  %s417_s0 = inlined_call_operand.vmem [shape: bf16[8,8], index: 0, kind: input, shape index: {}]   ;;  %s418_s3 = inlined_call_operand.vmem [shape: bf16[256,128], index: 3, kind: input, shape index: {}]   ;;  %s419_s2 = inlined_call_operand.vmem [shape: bf16[8,128], index: 2, kind: input, shape index: {}, may-alias: {1,2}]   ;;  %s420_s4 = inlined_call_operand.vmem [shape: f32[1,128], index: 4, kind: input, shape index: {}]   ;;  %s421_s5 = inlined_call_operand.vmem [shape: bf16[8,128], index: 5, kind: output, shape index: {}]  }
   0x1   :  { %297 = vmatprep.subr.bf16.mxu0 %v321_v0  ;;  %v22_v1 = vld [vmem:[%s416_s1] sm:$0xf]  ;;  %299 = vmatprep.mubr.msk.bf16.mxu0 %vm322_vm1, %v321_v0  ;;  %v305_v4 = vld [vmem:[%s418_s3 + $0x78] sm:$0xff]   ;;  %v307_v6 = vld [vmem:[%s418_s3 + $0x70] sm:$0xff]  }
   0x2   :  { %v21_v2 = vld [vmem:[%s417_s0] sm:$0xf]  ;;  %v29_v3 = vsel %vm27_vm0, %v22_v1, 0  ;;  %v306_v5 = vld [vmem:[%s418_s3 + $0x38] sm:$0xff]   ;;  %275 = vmatprep.subr.bf16.mxu1 %v305_v4  ;;  %v308_v7 = vld [vmem:[%s418_s3 + $0x30] sm:$0xff]  }
   0x3   :  { %298 = vmatpush3.bf16.msra.mxu0 %v29_v3  ;;  %276 = vmatpush3.bf16.msra.mxu1 %v306_v5  ;;  %v309_v8 = vld [vmem:[%s418_s3 + $0x68] sm:$0xff]   ;;  %v311_v10 = vld [vmem:[%s418_s3 + $0x60] sm:$0xff]   ;;  %v313_v12 = vld [vmem:[%s418_s3 + $0x58] sm:$0xff]  }
   0x4   :  { %277 = vmatprep.subr.bf16.mxu1 %v307_v6  ;;  %v310_v9 = vld [vmem:[%s418_s3 + $0x28] sm:$0xff]   ;;  %v312_v11 = vld [vmem:[%s418_s3 + $0x20] sm:$0xff]   ;;  %v314_v13 = vld [vmem:[%s418_s3 + $0x18] sm:$0xff]  }
   0x5   :  { %v315_v14 = vld [vmem:[%s418_s3 + $0x50] sm:$0xff]   ;;  %v317_v16 = vld [vmem:[%s418_s3 + $0x48] sm:$0xff]   ;;  %v319_v18 = vld [vmem:[%s418_s3 + $0x40] sm:$0xff]  }
   0x6   :  { %300 = vmatmul.mubr.msk.bf16.vlgmr.msra.gmra.mxu0 %vm23_vm2, %v21_v2  ;;  %v316_v15 = vld [vmem:[%s418_s3 + $0x10] sm:$0xff]   ;;  %v318_v17 = vld [vmem:[%s418_s3 + $0x8] sm:$0xff]   ;;  %v320_v19 = vld [vmem:[%s418_s3] sm:$0xff]  }
   0x7   :  { %278 = vmatpush3.bf16.msra.mxu1 %v308_v7  ;;  %v72_v20 = vld [vmem:[%s419_s2] sm:$0xf] }
   0x8   :  { %279 = vmatprep.subr.bf16.mxu1 %v309_v8  ;;  %240 = vmatprep.mubr.bf16.mxu1 %v72_v20  ;;  %v256_v27 = vld [vmem:[%s420_s4] ss:$0 sm:$0xff] }
   0xb   :  { %280 = vmatpush3.bf16.msra.mxu1 %v310_v9 }
   0xc   :  { %281 = vmatprep.subr.bf16.mxu1 %v311_v10 }
   0xf   :  { %282 = vmatpush3.bf16.msra.mxu1 %v312_v11 }
  0x10   :  { %283 = vmatprep.subr.bf16.mxu1 %v313_v12 }
  0x13   :  { %284 = vmatpush3.bf16.msra.mxu1 %v314_v13 }
  0x14   :  { %285 = vmatprep.subr.bf16.mxu1 %v315_v14 }
  0x17   :  { %286 = vmatpush3.bf16.msra.mxu1 %v316_v15 }
  0x18   :  { %287 = vmatprep.subr.bf16.mxu1 %v317_v16 }
  0x1b   :  { %288 = vmatpush3.bf16.msra.mxu1 %v318_v17 }
  0x1c   :  { %289 = vmatprep.subr.bf16.mxu1 %v319_v18 }
  0x1f   :  { %290 = vmatpush3.bf16.msra.mxu1 %v320_v19 }
  0xc6   :  { %v65_v21 = vpop.f32.mrf.mxu0 }
  0xc7   :  { %v71_v22 = vpack.c.bf16 %v65_v21, %v65_v21 }
  0xc8   :  { %v301_v23 = vpop.f32.mrf.mxu0 }
  0xc9   :  { %241 = vmatmul.mubr.bf16.vlgmr.msra.gmra.mxu1 %v71_v22 }
  0xca   :  { %v68_v24 = vpop.f32.mrf.mxu0 }
  0xcc   :  { %v302_v25 = vpop.f32.mrf.mxu0 }
 0x189   :  { %v291_v26 = vpop.f32.mrf.mxu1 }
 0x18b   :  { %v292_v28 = vpop.f32.mrf.mxu1 }
 0x18c   :  { %v293_v29 = vadd.f32 %v292_v28, %v291_v26 }
 0x18d   :  { %v294_v30 = vpop.f32.mrf.mxu1 }
 0x18e   :  { %v243_v31 = vadd.f32 %v293_v29, %v256_v27 }
 0x18f   :  { %v295_v32 = vpop.f32.mrf.mxu1 }
 0x190   :  { %v248_v33 = vmax.f32 %v243_v31, 0.0 }
 0x192   :  { %v249_v34 = vpack.c.bf16 %v248_v33, %v248_v33 }
 0x194   :  { %250 = vst [vmem:[%s421_s5] sm:$0xf] %v249_v34 }

// kernel: cfics_forward.3
= control target key start
LH: loop header
LB: loop body
LE: loop exit
PB: predicated region body
PF: predicated region fallthrough
CT: control target
= control target key end

     0   :  { %15 = vsyncpa [#allocation3], 0  ;;  %vm40_vm0 = vcmask 1043456   ;;  %vm36_vm1 = vcmask 64512   ;;  %v636_v1 = vmov 0.0   ;;  %vm637_vm2 = vmmov 0   ;;  %s810_s0 = inlined_call_operand.vmem [shape: bf16[8,8], index: 0, kind: input, shape index: {}]   ;;  %s811_s1 = inlined_call_operand.vmem [shape: bf16[8,128], index: 1, kind: input, shape index: {}, may-alias: {1,2}]   ;;  %s812_s2 = inlined_call_operand.vmem [shape: bf16[8,128], index: 2, kind: input, shape index: {}, may-alias: {1,2}]   ;;  %s813_s3 = inlined_call_operand.vmem [shape: bf16[8,128], index: 3, kind: input, shape index: {}]   ;;  %s814_s4 = inlined_call_operand.vmem [shape: bf16[256,128], index: 4, kind: input, shape index: {}]   ;;  %s815_s5 = inlined_call_operand.vmem [shape: f32[1,128], index: 5, kind: input, shape index: {}]   ;;  %s816_s6 = inlined_call_operand.vmem [shape: bf16[256,128], index: 6, kind: input, shape index: {}]   ;;  %s817_s7 = inlined_call_operand.vmem [shape: f32[1,128], index: 7, kind: input, shape index: {}]   ;;  %s818_s8 = inlined_call_operand.hbm [shape: f32[8,128], index: 8, kind: output, shape index: {0}]   ;;  %s819_s9 = inlined_call_operand.hbm [shape: f32[8,128], index: 9, kind: output, shape index: {1}]  }
   0x1   :  { %v35_v0 = vld [vmem:[%s811_s1] sm:$0xf]  ;;  %550 = vmatprep.subr.bf16.mxu0 %v636_v1  ;;  %552 = vmatprep.mubr.msk.bf16.mxu0 %vm637_vm2, %v636_v1  ;;  %v560_v4 = vld [vmem:[%s814_s4 + $0x78] sm:$0xff]   ;;  %v562_v6 = vld [vmem:[%s814_s4 + $0x70] sm:$0xff]  }
   0x2   :  { %v42_v2 = vsel %vm40_vm0, %v35_v0, 0  ;;  %v34_v3 = vld [vmem:[%s810_s0] sm:$0xf]  ;;  %506 = vmatprep.subr.bf16.mxu1 %v560_v4  ;;  %v561_v5 = vld [vmem:[%s814_s4 + $0x38] sm:$0xff]   ;;  %v563_v7 = vld [vmem:[%s814_s4 + $0x30] sm:$0xff]  }
   0x3   :  { %551 = vmatpush3.bf16.msra.mxu0 %v42_v2  ;;  %507 = vmatpush3.bf16.msra.mxu1 %v561_v5  ;;  %v564_v8 = vld [vmem:[%s814_s4 + $0x68] sm:$0xff]   ;;  %v566_v10 = vld [vmem:[%s814_s4 + $0x60] sm:$0xff]   ;;  %v568_v12 = vld [vmem:[%s814_s4 + $0x58] sm:$0xff]  }
   0x4   :  { %508 = vmatprep.subr.bf16.mxu1 %v562_v6  ;;  %v565_v9 = vld [vmem:[%s814_s4 + $0x28] sm:$0xff]   ;;  %v567_v11 = vld [vmem:[%s814_s4 + $0x20] sm:$0xff]   ;;  %v569_v13 = vld [vmem:[%s814_s4 + $0x18] sm:$0xff]  }
   0x5   :  { %v570_v14 = vld [vmem:[%s814_s4 + $0x50] sm:$0xff]   ;;  %v572_v16 = vld [vmem:[%s814_s4 + $0x48] sm:$0xff]   ;;  %v574_v18 = vld [vmem:[%s814_s4 + $0x40] sm:$0xff]  }
   0x6   :  { %553 = vmatmul.mubr.msk.bf16.vlgmr.msra.gmra.mxu0 %vm36_vm1, %v34_v3  ;;  %v571_v15 = vld [vmem:[%s814_s4 + $0x10] sm:$0xff]   ;;  %v573_v17 = vld [vmem:[%s814_s4 + $0x8] sm:$0xff]  }
   0x7   :  { %509 = vmatpush3.bf16.msra.mxu1 %v563_v7 }
   0x8   :  { %510 = vmatprep.subr.bf16.mxu1 %v564_v8 }
   0xb   :  { %511 = vmatpush3.bf16.msra.mxu1 %v565_v9 }
   0xc   :  { %512 = vmatprep.subr.bf16.mxu1 %v566_v10 }
   0xf   :  { %513 = vmatpush3.bf16.msra.mxu1 %v567_v11 }
  0x10   :  { %514 = vmatprep.subr.bf16.mxu1 %v568_v12 }
  0x13   :  { %515 = vmatpush3.bf16.msra.mxu1 %v569_v13 }
  0x14   :  { %516 = vmatprep.subr.bf16.mxu1 %v570_v14 }
  0x17   :  { %517 = vmatpush3.bf16.msra.mxu1 %v571_v15 }
  0x18   :  { %518 = vmatprep.subr.bf16.mxu1 %v572_v16 }
  0x19   :  { %16 = vsyncpa [#allocation5], 0  ;;  %v575_v19 = vld [vmem:[%s814_s4] sm:$0xff]   ;;  %v576_v21 = vld [vmem:[%s816_s6 + $0x78] sm:$0xff]  }
  0x1a   :  { %v85_v20 = vld [vmem:[%s812_s2] sm:$0xf]  ;;  %v577_v22 = vld [vmem:[%s816_s6 + $0x38] sm:$0xff]   ;;  %v578_v23 = vld [vmem:[%s816_s6 + $0x70] sm:$0xff]   ;;  %528 = vmatprep.subr.bf16.mxu0 %v576_v21 }
  0x1b   :  { %519 = vmatpush3.bf16.msra.mxu1 %v573_v17  ;;  %253 = vmatprep.mubr.bf16.mxu1 %v85_v20  ;;  %v579_v24 = vld [vmem:[%s816_s6 + $0x30] sm:$0xff]   ;;  %v580_v25 = vld [vmem:[%s816_s6 + $0x68] sm:$0xff]   ;;  %v582_v27 = vld [vmem:[%s816_s6 + $0x60] sm:$0xff]  }
  0x1c   :  { %520 = vmatprep.subr.bf16.mxu1 %v574_v18  ;;  %529 = vmatpush3.bf16.msra.mxu0 %v577_v22  ;;  %v581_v26 = vld [vmem:[%s816_s6 + $0x28] sm:$0xff]   ;;  %v583_v28 = vld [vmem:[%s816_s6 + $0x20] sm:$0xff]   ;;  %v584_v29 = vld [vmem:[%s816_s6 + $0x58] sm:$0xff]  }
  0x1d   :  { %530 = vmatprep.subr.bf16.mxu0 %v578_v23  ;;  %v585_v30 = vld [vmem:[%s816_s6 + $0x18] sm:$0xff]   ;;  %v586_v36 = vld [vmem:[%s816_s6 + $0x50] sm:$0xff]   ;;  %v588_v38 = vld [vmem:[%s816_s6 + $0x48] sm:$0xff]  }
  0x1e   :  { %v587_v37 = vld [vmem:[%s816_s6 + $0x10] sm:$0xff]   ;;  %v589_v39 = vld [vmem:[%s816_s6 + $0x8] sm:$0xff]   ;;  %v590_v40 = vld [vmem:[%s816_s6 + $0x40] sm:$0xff]  }
  0x1f   :  { %521 = vmatpush3.bf16.msra.mxu1 %v575_v19  ;;  %v591_v41 = vld [vmem:[%s816_s6] sm:$0xff]   ;;  %s638_s6 = smov [#allocation4]  }
  0x20   :  { %531 = vmatpush3.bf16.msra.mxu0 %v579_v24  ;;  %v470_v43 = vld [vmem:[%s815_s5] ss:$0 sm:$0xff]  ;;  %s457_s10 = sshll.u32 %s638_s6, 4  ;;  %s458_s10 = int_to_ptr.vmem [resolvable:$true] %s457_s10 }
  0x21   :  { %532 = vmatprep.subr.bf16.mxu0 %v580_v25  ;;  %v263_v51 = vld [vmem:[%s813_s3] sm:$0xf]  ;;  %s592_s11 = scalar_lea.vmem %s458_s10, 128  ;;  %p597_p1 = scmp.lt.s32.totalorder %s458_s10, %s458_s10 }
  0x22   :  { %p593_p0 = scmp.ne.s32.totalorder %s458_s10, %s592_s11  ;;  %p598_p2 = scmp.lt.s32.totalorder %s592_s11, %s592_s11 }
  0x24   :  { %533 = vmatpush3.bf16.msra.mxu0 %v581_v26  ;;  %p599_p3 = por %p598_p2, %p597_p1 }
  0x25   :  { %534 = vmatprep.subr.bf16.mxu0 %v582_v27 }
  0x26   :  { %p600_p4 = pnand %p599_p3, %p593_p0 }
  0x28   :  { %535 = vmatpush3.bf16.msra.mxu0 %v583_v28 }
  0x29   :  { %536 = vmatprep.subr.bf16.mxu0 %v584_v29 }
  0x2c   :  { %537 = vmatpush3.bf16.msra.mxu0 %v585_v30 }
  0x2d   :  { %538 = vmatprep.subr.bf16.mxu0 %v586_v36 }
  0x30   :  { %539 = vmatpush3.bf16.msra.mxu0 %v587_v37 }
  0x31   :  { %540 = vmatprep.subr.bf16.mxu0 %v588_v38 }
  0x34   :  { %541 = vmatpush3.bf16.msra.mxu0 %v589_v39 }
  0x35   :  { %542 = vmatprep.subr.bf16.mxu0 %v590_v40 }
  0x38   :  { %543 = vmatpush3.bf16.msra.mxu0 %v591_v41 }
  0xc6   :  { %v78_v31 = vpop.f32.mrf.mxu0 }
  0xc7   :  { %v84_v32 = vpack.c.bf16 %v78_v31, %v78_v31 }
  0xc8   :  { %v554_v33 = vpop.f32.mrf.mxu0 }
  0xc9   :  { %254 = vmatmul.mubr.bf16.vlgmr.msra.gmra.mxu1 %v84_v32 }
  0xca   :  { %v81_v34 = vpop.f32.mrf.mxu0 }
  0xcc   :  { %v555_v35 = vpop.f32.mrf.mxu0 }
 0x189   :  { %v522_v42 = vpop.f32.mrf.mxu1 }
 0x18b   :  { %v523_v44 = vpop.f32.mrf.mxu1 }
 0x18c   :  { %v524_v45 = vadd.f32 %v523_v44, %v522_v42 }
 0x18d   :  { %v525_v46 = vpop.f32.mrf.mxu1 }
 0x18e   :  { %v256_v47 = vadd.f32 %v524_v45, %v470_v43 }
 0x18f   :  { %v526_v48 = vpop.f32.mrf.mxu1 }
 0x190   :  { %v261_v49 = vmax.f32 %v256_v47, 0.0 }
 0x192   :  { %262 = vst [vmem:[#allocation4] sm:$0xff] %v261_v49  ;;  %v264_v50 = vpack.c.bf16 %v261_v49, %v261_v49 }
 0x194   :  { %432 = vmatprep.mubr.bf16.mxu0 %v264_v50 }
 0x195   :  { %433 = vmatmul.mubr.bf16.vlgmr.msra.gmra.mxu0 %v263_v51 }
 0x196   :  { %603 = shalt.err (!%p600_p4)
}
 0x197   :  { %460 = dma.vmem_to_hbm [thread:$0]  %s458_s10, 128, %s819_s9, [#allocation5]   ;;  %v487_v54 = vld [vmem:[%s817_s7] ss:$0 sm:$0xff] }
 0x198   :  { %s639_s14 = smov [#allocation2]  }
 0x199   :  { %s447_s15 = sshll.u32 %s639_s14, 4  ;;  %s448_s15 = int_to_ptr.vmem [resolvable:$true] %s447_s15 }
 0x19a   :  { %s612_s16 = scalar_lea.vmem %s448_s15, 128  ;;  %p617_p6 = scmp.lt.s32.totalorder %s448_s15, %s448_s15 }
 0x19b   :  { %p613_p5 = scmp.ne.s32.totalorder %s448_s15, %s612_s16  ;;  %p618_p7 = scmp.lt.s32.totalorder %s612_s16, %s612_s16 }
 0x19d   :  { %p619_p8 = por %p618_p7, %p617_p6 }
 0x19f   :  { %p620_p9 = pnand %p619_p8, %p613_p5 }
 0x255   :  { %v544_v52 = vpop.f32.mrf.mxu0 }
 0x257   :  { %v545_v53 = vpop.f32.mrf.mxu0 }
 0x258   :  { %v546_v55 = vadd.f32 %v545_v53, %v544_v52 }
 0x259   :  { %v547_v56 = vpop.f32.mrf.mxu0 }
 0x25a   :  { %v435_v57 = vadd.f32 %v546_v55, %v487_v54 }
 0x25b   :  { %v548_v58 = vpop.f32.mrf.mxu0 }
 0x25c   :  { %440 = vst [vmem:[#allocation2] sm:$0xff] %v435_v57 }
 0x25d   :  { %623 = shalt.err (!%p620_p9)
}
 0x25e   :  { %450 = dma.vmem_to_hbm [thread:$0]  %s448_s15, 128, %s818_s8, [#allocation3]  }
 0x25f   :  { %632 = dma.done.wait [#allocation3], 128  }
 0x260   :  { %633 = vsyncadd [#allocation3], 4294967168 }
 0x261   :  { %634 = dma.done.wait [#allocation5], 128  }
 0x262   :  { %635 = vsyncadd [#allocation5], 4294967168 }
 0x263   :  { %467 = vsyncpa [#allocation3], 1 }
 0x264   :  { %468 = vsyncpa [#allocation5], 1 }

</bundles_post_ra>
